<compile_context>
chip_gen: v5e
topology: v5e:2x2
jax: 0.10.0
libtpu: 0.0.40
codegen_flags: <defaults>
</compile_context>

<pallas_src>
import jax
import jax.numpy as jnp
from jax import lax
from jax.experimental import pallas as pl
from jax.experimental.pallas import tpu as pltpu


# --------------------------- in-kernel building blocks ---------------------------

def _prelu(y, alpha):
    return jnp.where(y >= 0.0, y, alpha * y)


def _shift_rows(y, dy):
    """v[h, :] = y[h + dy, :], zero-padded at the image border (dy in {-1, +1})."""
    h, wc = y.shape
    zero = jnp.zeros((1, wc), y.dtype)
    if dy == 1:
        return jnp.concatenate([y[1:, :], zero], axis=0)
    return jnp.concatenate([zero, y[:h - 1, :]], axis=0)


def _shift_w(y, dx, c, lane_idx):
    """v[h, w*C + ch] = y[h, (w+dx)*C + ch], zero outside the image (dx in {-1,+1}).

    The W axis lives on lanes (packed as w*C + ch), so the shift is a lane
    rotation by C (XLU slot) plus a border mask on the wrapped lane group.
    """
    _, wc = y.shape
    v = pltpu.roll(y, shift=(-dx * c) % wc, axis=1)
    if dx == 1:
        return jnp.where(lane_idx < wc - c, v, 0.0)
    return jnp.where(lane_idx >= c, v, 0.0)


def _depthwise3x3(y, w9, b, c):
    """'same' 3x3 depthwise cross-correlation on a (H, W*C) lane-packed tile."""
    h, wc = y.shape
    lane = lax.broadcasted_iota(jnp.int32, (h, wc), 1)
    rows = {-1: _shift_rows(y, -1), 0: y, 1: _shift_rows(y, 1)}
    acc = jnp.zeros((h, wc), jnp.float32) + b                        # bias folded in
    for dy in (-1, 0, 1):
        for dx in (-1, 0, 1):
            k = (dy + 1) * 3 + (dx + 1)
            v = rows[dy]
            if dx != 0:
                v = _shift_w(v, dx, c, lane)
            acc = acc + v * w9[k:k + 1, :]
    return acc


def _channel_stats(y):
    """(2, W*C) packed partial BN stats: [sum; sum of squares] over the H rows."""
    s = jnp.sum(y, axis=0, keepdims=True)
    ss = jnp.sum(y * y, axis=0, keepdims=True)
    return jnp.concatenate([s, ss], axis=0)                          # single store


def _fold_bn(stats_all, gamma, beta, lane2chan, chan2lane, inv_count, eps):
    """Fold whole-batch BN stats into packed per-lane scale/bias, in-kernel.

    stats_all: (N, 2, W*C) per-image partials.  lane2chan: (W*C, C) 0/1 matrix
    summing the W copies of each channel (MXU).  chan2lane: (C, lanes) 0/1
    matrix broadcasting per-channel values back onto the packed lane layout.
    """
    sums = jnp.sum(stats_all, axis=0)                                          # (2, W*C)
    tot = jnp.dot(sums, lane2chan, preferred_element_type=jnp.float32)         # (2, C)
    mean = tot[0:1, :] * inv_count
    var = jnp.maximum(tot[1:2, :] * inv_count - mean * mean, 0.0)
    scale_c = gamma * lax.rsqrt(var + eps)
    bias_c = beta - mean * scale_c
    scale = jnp.dot(scale_c, chan2lane, preferred_element_type=jnp.float32)
    bias = jnp.dot(bias_c, chan2lane, preferred_element_type=jnp.float32)
    return scale, bias


def _pool2x2(y, row_sel, col_sel, c, op):
    """2x2 / stride-2 windowed `op` (max or min) of a (H, W*C) lane-packed tile.

    Row/col pairing uses a zero-row concat / a lane rotation; whatever lands on
    odd rows / odd w-groups is discarded by the 0/1 selection matmuls
    (row_sel: (H/2, H), col_sel: (W*C, (W/2)*C)), so the result is exact.
    """
    _, wc = y.shape
    r = op(y, _shift_rows(y, 1))                                     # pair rows (h, h+1)
    r = op(r, pltpu.roll(r, shift=wc - c, axis=1))                   # pair cols (w, w+1)
    r = jnp.dot(row_sel, r, preferred_element_type=jnp.float32)      # keep even rows
    return jnp.dot(r, col_sel, preferred_element_type=jnp.float32)   # keep even cols


# ------------------------------------ wrapper ------------------------------------

def xception_block(x_nchw, p):
    """XceptionBlock forward (training-mode BN), NCHW in / NCHW out."""
    x = jnp.transpose(x_nchw, (0, 2, 3, 1)).astype(jnp.float32)      # NCHW -> NHWC
    N, H, W, Cin = x.shape
    Cout = p['wa'].shape[1]
    Hp, Wp = H // 2, W // 2
    WC = W * Cout
    eps = 1e-5
    inv_count = 1.0 / float(N * H * W)
    a1 = float(p['alpha1'])
    am = float(p['alpha_mid'])
    a2 = float(p['alpha2'])

    # ---- wrapper-side layout plumbing: pack (W, C) onto the lane axis ----------
    xp = x.reshape(N, H, W * Cin)                                    # lane j = w*Cin + ci
    eye_w = jnp.eye(W, dtype=jnp.float32)
    eye_c = jnp.eye(Cout, dtype=jnp.float32)
    sel_w = eye_w[:, 0::2]                                           # (W, Wp): keep even w
    row_sel = jnp.eye(H, dtype=jnp.float32)[0::2, :]                 # (Hp, H): keep even h
    col_sel = jnp.kron(sel_w, eye_c)                                 # (W*C, Wp*C)
    lane2chan = jnp.kron(jnp.ones((W, 1), jnp.float32), eye_c)       # (W*C, C)
    chan2lane = jnp.kron(jnp.ones((1, W), jnp.float32), eye_c)       # (C, W*C)
    chan2lane_half = jnp.kron(jnp.ones((1, Wp), jnp.float32), eye_c)  # (C, Wp*C)

    # 1x1 convs as block-diagonal packed MXU matmuls; stride-2 W-subsample of the
    # shortcut conv folded into its packed weight.
    wa_blk = jnp.kron(sel_w, p['wa'])                                # (W*Cin, Wp*Cout)
    pw1_blk = jnp.kron(eye_w, p['pw1_w'])                            # (W*Cin, W*Cout)
    pw2_blk = jnp.kron(eye_w, p['pw2_w'])                            # (W*Cout, W*Cout)
    ba_p = jnp.tile(p['ba'], (1, Wp))
    pw1b_p = jnp.tile(p['pw1_b'], (1, W))
    pw2b_p = jnp.tile(p['pw2_b'], (1, W))
    dw1_p = jnp.tile(p['dw1_w'].reshape(9, Cout), (1, W))
    dw2_p = jnp.tile(p['dw2_w'].reshape(9, Cout), (1, W))
    dw1b_p = jnp.tile(p['dw1_b'], (1, W))
    dw2b_p = jnp.tile(p['dw2_b'], (1, W))

    cparams = pltpu.CompilerParams(
        dimension_semantics=("parallel",),                           # batch tiles -> both TCs
        vmem_limit_bytes=32 * 1024 * 1024)

    def tile(r, c):                                                  # one image per grid step
        return pl.BlockSpec((None, r, c), lambda n: (n, 0, 0))

    def full(shape):                                                 # small array, VMEM resident
        nd = len(shape)
        return pl.BlockSpec(shape, lambda n: (0,) * nd)

    # ---- stage 1: shortcut conv + SepBlock1 (pre-BN) + BN1 partial stats -------
    def stage1_kernel(x_ref, rsel_ref, waw_ref, wab_ref, pw1w_ref, pw1b_ref,
                      dw1w_ref, dw1b_ref, y1_ref, a_ref, st1_ref):
        xt = x_ref[...]
        # conv1_1 (1x1, stride 2): even-row select (MXU) then packed 1x1 matmul.
        x_even = jnp.dot(rsel_ref[...], xt, preferred_element_type=jnp.float32)
        a_ref[...] = (jnp.dot(x_even, waw_ref[...],
                              preferred_element_type=jnp.float32) + wab_ref[...])
        # SepBlock1 up to its PReLU (BN1 applied next stage with global stats).
        y = jnp.dot(xt, pw1w_ref[...], preferred_element_type=jnp.float32) + pw1b_ref[...]
        y = _depthwise3x3(y, dw1w_ref[...], dw1b_ref[...], Cout)
        y = _prelu(y, a1)
        y1_ref[...] = y.astype(y1_ref.dtype)                         # bf16 storage, f32 math
        st1_ref[...] = _channel_stats(y)                             # stats from pre-cast f32

    y1, a_br, stats1 = pl.pallas_call(
        stage1_kernel,
        out_shape=(jax.ShapeDtypeStruct((N, H, WC), jnp.bfloat16),   # y1 (pre-BN1)
                   jax.ShapeDtypeStruct((N, Hp, Wp * Cout), jnp.float32),  # shortcut branch
                   jax.ShapeDtypeStruct((N, 2, WC), jnp.float32)),   # BN1 partials
        grid=(N,),
        in_specs=[tile(H, W * Cin),
                  full((Hp, H)), full((W * Cin, Wp * Cout)), full((1, Wp * Cout)),
                  full((W * Cin, WC)), full((1, WC)),
                  full((9, WC)), full((1, WC))],
        out_specs=(tile(H, WC), tile(Hp, Wp * Cout), tile(2, WC)),
        compiler_params=cparams,
    )(xp, row_sel, wa_blk, ba_p, pw1_blk, pw1b_p, dw1_p, dw1b_p)

    # ---- stage 2: BN1 fold+apply, mid PReLU, SepBlock2 (pre-BN), BN2 partials,
    #      and the exact 2x2 windowed max/min of the pre-BN2 activation ---------
    def stage2_kernel(y1_ref, st1_ref, g1_ref, b1_ref, l2c_ref, c2l_ref,
                      pw2w_ref, pw2b_ref, dw2w_ref, dw2b_ref, rsel_ref, csel_ref,
                      ymax_ref, ymin_ref, st2_ref):
        scale, bias = _fold_bn(st1_ref[...], g1_ref[...], b1_ref[...],
                               l2c_ref[...], c2l_ref[...], inv_count, eps)
        z = y1_ref[...].astype(jnp.float32) * scale + bias
        z = _prelu(z, am)
        y = jnp.dot(z, pw2w_ref[...], preferred_element_type=jnp.float32) + pw2b_ref[...]
        y = _depthwise3x3(y, dw2w_ref[...], dw2b_ref[...], Cout)
        y = _prelu(y, a2)
        st2_ref[...] = _channel_stats(y)
        ymax_ref[...] = _pool2x2(y, rsel_ref[...], csel_ref[...], Cout, jnp.maximum)
        ymin_ref[...] = _pool2x2(y, rsel_ref[...], csel_ref[...], Cout, jnp.minimum)

    ymax, ymin, stats2 = pl.pallas_call(
        stage2_kernel,
        out_shape=(jax.ShapeDtypeStruct((N, Hp, Wp * Cout), jnp.float32),
                   jax.ShapeDtypeStruct((N, Hp, Wp * Cout), jnp.float32),
                   jax.ShapeDtypeStruct((N, 2, WC), jnp.float32)),
        grid=(N,),
        in_specs=[tile(H, WC),
                  full((N, 2, WC)),
                  full((1, Cout)), full((1, Cout)),
                  full((WC, Cout)), full((Cout, WC)),
                  full((WC, WC)), full((1, WC)),
                  full((9, WC)), full((1, WC)),
                  full((Hp, H)), full((WC, Wp * Cout))],
        out_specs=(tile(Hp, Wp * Cout), tile(Hp, Wp * Cout), tile(2, WC)),
        compiler_params=cparams,
    )(y1, stats1, p['bn1_g'], p['bn1_b'], lane2chan, chan2lane,
      pw2_blk, pw2b_p, dw2_p, dw2b_p, row_sel, col_sel)

    # ---- stage 3: BN2 fold + apply to pooled max/min + residual add ------------
    # max(s*vmax + t, s*vmin + t) == maxpool(s*v + t) exactly, for either sign of s.
    def stage3_kernel(a_ref, ymax_ref, ymin_ref, st2_ref, g2_ref, b2_ref,
                      l2c_ref, c2l_ref, out_ref):
        scale, bias = _fold_bn(st2_ref[...], g2_ref[...], b2_ref[...],
                               l2c_ref[...], c2l_ref[...], inv_count, eps)
        hi = ymax_ref[...] * scale + bias
        lo = ymin_ref[...] * scale + bias
        out_ref[...] = a_ref[...] + jnp.maximum(hi, lo)

    out_p = pl.pallas_call(
        stage3_kernel,
        out_shape=jax.ShapeDtypeStruct((N, Hp, Wp * Cout), jnp.float32),
        grid=(N,),
        in_specs=[tile(Hp, Wp * Cout), tile(Hp, Wp * Cout), tile(Hp, Wp * Cout),
                  full((N, 2, WC)),
                  full((1, Cout)), full((1, Cout)),
                  full((WC, Cout)), full((Cout, Wp * Cout))],
        out_specs=tile(Hp, Wp * Cout),
        compiler_params=cparams,
    )(a_br, ymax, ymin, stats2, p['bn2_g'], p['bn2_b'], lane2chan, chan2lane_half)

    out = out_p.reshape(N, Hp, Wp, Cout)
    return jnp.transpose(out, (0, 3, 1, 2))                          # NHWC -> NCHW


# ------------------------------ pure-JAX reference -------------------------------

def reference_nchw(x_nchw, p):
    """Pure-JAX reference mirroring PyTorch semantics (for validation)."""
    x = jnp.transpose(x_nchw, (0, 2, 3, 1)).astype(jnp.float32)
    Cout = p['wa'].shape[1]
    dn = ('NHWC', 'HWIO', 'NHWC')

    def conv(v, w, b, stride, groups, padding):
        y = lax.conv_general_dilated(v, w, (stride, stride), padding,
                                     dimension_numbers=dn,
                                     feature_group_count=groups,
                                     precision=lax.Precision.HIGHEST)
        return y + b.reshape(1, 1, 1, -1)

    prelu = lambda v, a: jnp.where(v >= 0, v, a * v)

    def bn(v, g, b_):
        m = jnp.mean(v, axis=(0, 1, 2), keepdims=True)
        var = jnp.mean((v - m) ** 2, axis=(0, 1, 2), keepdims=True)
        return (v - m) / jnp.sqrt(var + 1e-5) * g.reshape(1, 1, 1, -1) + b_.reshape(1, 1, 1, -1)

    a = conv(x, p['wa'][None, None], p['ba'], 2, 1, 'VALID')

    y = conv(x, p['pw1_w'][None, None], p['pw1_b'], 1, 1, 'VALID')
    y = conv(y, p['dw1_w'][:, :, None, :], p['dw1_b'], 1, Cout, 'SAME')
    y = bn(prelu(y, p['alpha1']), p['bn1_g'], p['bn1_b'])

    y = prelu(y, p['alpha_mid'])

    y = conv(y, p['pw2_w'][None, None], p['pw2_b'], 1, 1, 'VALID')
    y = conv(y, p['dw2_w'][:, :, None, :], p['dw2_b'], 1, Cout, 'SAME')
    y = bn(prelu(y, p['alpha2']), p['bn2_g'], p['bn2_b'])

    b = lax.reduce_window(y, -jnp.inf, lax.max, (1, 2, 2, 1), (1, 2, 2, 1), 'VALID')
    return jnp.transpose(a + b, (0, 3, 1, 2))


if __name__ == "__main__":
    N, Cin, Cout, H, W = 2, 4, 8, 16, 16

    key = jax.random.PRNGKey(0)
    keys = jax.random.split(key, 12)
    params = {
        # conv1_1: Conv2d(Cin, Cout, 1x1, stride=2)
        'wa':    0.2 * jax.random.normal(keys[0], (Cin, Cout), jnp.float32),
        'ba':    0.1 * jax.random.normal(keys[1], (1, Cout), jnp.float32),
        # SeparableConvBlock 1
        'pw1_w': 0.2 * jax.random.normal(keys[2], (Cin, Cout), jnp.float32),
        'pw1_b': 0.1 * jax.random.normal(keys[3], (1, Cout), jnp.float32),
        'dw1_w': 0.2 * jax.random.normal(keys[4], (3, 3, Cout), jnp.float32),
        'dw1_b': 0.1 * jax.random.normal(keys[5], (1, Cout), jnp.float32),
        'bn1_g': jnp.ones((1, Cout), jnp.float32),
        'bn1_b': jnp.zeros((1, Cout), jnp.float32),
        # SeparableConvBlock 2
        'pw2_w': 0.2 * jax.random.normal(keys[6], (Cout, Cout), jnp.float32),
        'pw2_b': 0.1 * jax.random.normal(keys[7], (1, Cout), jnp.float32),
        'dw2_w': 0.2 * jax.random.normal(keys[8], (3, 3, Cout), jnp.float32),
        'dw2_b': 0.1 * jax.random.normal(keys[9], (1, Cout), jnp.float32),
        'bn2_g': jnp.ones((1, Cout), jnp.float32),
        'bn2_b': jnp.zeros((1, Cout), jnp.float32),
        # PReLU parameters (PyTorch default init)
        'alpha1': 0.25, 'alpha_mid': 0.25, 'alpha2': 0.25,
    }

    x = jax.random.normal(keys[10], (N, Cin, H, W), jnp.float32)     # NCHW, like PyTorch

    out = xception_block(x, params)
    out = jax.block_until_ready(out)

    ref = reference_nchw(x, params)
    assert out.shape == (N, Cout, H // 2, W // 2), out.shape
    err = float(jnp.max(jnp.abs(out - ref)))
    # y1 is stored as bf16 between stages (storage only, math stays f32); after the
    # two BN rescalings the worst-case propagated rounding error is O(1e-2) here.
    assert err < 3e-2, f"max abs err {err}"

    print("KERNEL_OK")
</pallas_src>

<mosaic_0001>
module attributes {stable_mosaic.version = 11 : i64} {
  func.func @stage1_kernel(%arg0: i32, %arg1: memref<1x16x64xf32, #tpu.memory_space<vmem>>, %arg2: memref<8x16xf32, #tpu.memory_space<vmem>>, %arg3: memref<64x64xf32, #tpu.memory_space<vmem>>, %arg4: memref<1x64xf32, #tpu.memory_space<vmem>>, %arg5: memref<64x128xf32, #tpu.memory_space<vmem>>, %arg6: memref<1x128xf32, #tpu.memory_space<vmem>>, %arg7: memref<9x128xf32, #tpu.memory_space<vmem>>, %arg8: memref<1x128xf32, #tpu.memory_space<vmem>>, %arg9: memref<1x16x128xbf16, #tpu.memory_space<vmem>>, %arg10: memref<1x8x64xf32, #tpu.memory_space<vmem>>, %arg11: memref<1x2x128xf32, #tpu.memory_space<vmem>>) attributes {dimension_semantics = [#tpu.dimension_semantics<parallel>], iteration_bounds = array<i64: 2>, scalar_prefetch = 0 : i64, scratch_operands = 0 : i64, tpu.core_type = #tpu.core_type<tc>, window_params = [{transform_indices = @transform_0, window_bounds = array<i64: 1, 16, 64>}, {pipeline_mode = #tpu.pipeline_mode<synchronous>, transform_indices = @transform_1, window_bounds = array<i64: 8, 16>}, {pipeline_mode = #tpu.pipeline_mode<synchronous>, transform_indices = @transform_2, window_bounds = array<i64: 64, 64>}, {pipeline_mode = #tpu.pipeline_mode<synchronous>, transform_indices = @transform_3, window_bounds = array<i64: 1, 64>}, {pipeline_mode = #tpu.pipeline_mode<synchronous>, transform_indices = @transform_4, window_bounds = array<i64: 64, 128>}, {pipeline_mode = #tpu.pipeline_mode<synchronous>, transform_indices = @transform_5, window_bounds = array<i64: 1, 128>}, {pipeline_mode = #tpu.pipeline_mode<synchronous>, transform_indices = @transform_6, window_bounds = array<i64: 9, 128>}, {pipeline_mode = #tpu.pipeline_mode<synchronous>, transform_indices = @transform_7, window_bounds = array<i64: 1, 128>}, {transform_indices = @transform_8, window_bounds = array<i64: 1, 16, 128>}, {transform_indices = @transform_9, window_bounds = array<i64: 1, 8, 64>}, {transform_indices = @transform_10, window_bounds = array<i64: 1, 2, 128>}]} {
    %c0 = arith.constant 0 : index
    %c0_0 = arith.constant 0 : index
    %c0_1 = arith.constant 0 : index
    %0 = vector.load %arg1[%c0, %c0_0, %c0_1] : memref<1x16x64xf32, #tpu.memory_space<vmem>>, vector<1x16x64xf32>
    %1 = vector.shape_cast %0 : vector<1x16x64xf32> to vector<16x64xf32>
    %c0_2 = arith.constant 0 : index
    %c0_3 = arith.constant 0 : index
    %2 = vector.load %arg2[%c0_2, %c0_3] : memref<8x16xf32, #tpu.memory_space<vmem>>, vector<8x16xf32>
    %cst = arith.constant dense<0.000000e+00> : vector<8x64xf32>
    %3 = tpu.matmul %2, %1, %cst {dimension_numbers = #tpu.dot_dimension_numbers<[1], [0], [0], [1], [0, 0, 1, 1], [], []>} : vector<8x16xf32>, vector<16x64xf32>, vector<8x64xf32> -> vector<8x64xf32>
    %c0_4 = arith.constant 0 : index
    %c0_5 = arith.constant 0 : index
    %4 = vector.load %arg3[%c0_4, %c0_5] : memref<64x64xf32, #tpu.memory_space<vmem>>, vector<64x64xf32>
    %cst_6 = arith.constant dense<0.000000e+00> : vector<8x64xf32>
    %5 = tpu.matmul %3, %4, %cst_6 {dimension_numbers = #tpu.dot_dimension_numbers<[1], [0], [0], [1], [0, 0, 1, 1], [], []>} : vector<8x64xf32>, vector<64x64xf32>, vector<8x64xf32> -> vector<8x64xf32>
    %c0_7 = arith.constant 0 : index
    %c0_8 = arith.constant 0 : index
    %6 = vector.load %arg4[%c0_7, %c0_8] : memref<1x64xf32, #tpu.memory_space<vmem>>, vector<1x64xf32>
    %7 = vector.broadcast %6 : vector<1x64xf32> to vector<8x64xf32>
    %8 = arith.addf %5, %7 : vector<8x64xf32>
    %c0_9 = arith.constant 0 : index
    %c0_10 = arith.constant 0 : index
    %c0_11 = arith.constant 0 : index
    %9 = vector.load %arg10[%c0_9, %c0_10, %c0_11] : memref<1x8x64xf32, #tpu.memory_space<vmem>>, vector<1x8x64xf32>
    %10 = vector.shape_cast %9 : vector<1x8x64xf32> to vector<8x64xf32>
    %11 = vector.shape_cast %8 : vector<8x64xf32> to vector<1x8x64xf32>
    tpu.vector_store %arg10[%c0_9, %c0_10, %c0_11], %11 {strides = array<i32>} : memref<1x8x64xf32, #tpu.memory_space<vmem>>, vector<1x8x64xf32>,
    %c0_12 = arith.constant 0 : index
    %c0_13 = arith.constant 0 : index
    %12 = vector.load %arg5[%c0_12, %c0_13] : memref<64x128xf32, #tpu.memory_space<vmem>>, vector<64x128xf32>
    %cst_14 = arith.constant dense<0.000000e+00> : vector<16x128xf32>
    %13 = tpu.matmul %1, %12, %cst_14 {dimension_numbers = #tpu.dot_dimension_numbers<[1], [0], [0], [1], [0, 0, 1, 1], [], []>} : vector<16x64xf32>, vector<64x128xf32>, vector<16x128xf32> -> vector<16x128xf32>
    %c0_15 = arith.constant 0 : index
    %c0_16 = arith.constant 0 : index
    %14 = vector.load %arg6[%c0_15, %c0_16] : memref<1x128xf32, #tpu.memory_space<vmem>>, vector<1x128xf32>
    %15 = vector.broadcast %14 : vector<1x128xf32> to vector<16x128xf32>
    %16 = arith.addf %13, %15 : vector<16x128xf32>
    %c0_17 = arith.constant 0 : index
    %c0_18 = arith.constant 0 : index
    %17 = vector.load %arg7[%c0_17, %c0_18] : memref<9x128xf32, #tpu.memory_space<vmem>>, vector<9x128xf32>
    %c0_19 = arith.constant 0 : index
    %c0_20 = arith.constant 0 : index
    %18 = vector.load %arg8[%c0_19, %c0_20] : memref<1x128xf32, #tpu.memory_space<vmem>>, vector<1x128xf32>
    %19 = tpu.iota {dimensions = array<i32: 1>} : vector<16x128xi32>
    %cst_21 = arith.constant 0.000000e+00 : f32
    %20 = vector.broadcast %cst_21 : f32 to vector<1x128xf32>
    %21 = vector.extract_strided_slice %16 {offsets = [0, 0], sizes = [15, 128], strides = [1, 1]} : vector<16x128xf32> to vector<15x128xf32>
    %22 = tpu.concatenate %20, %21 in 0 : vector<1x128xf32>, vector<15x128xf32> -> vector<16x128xf32>
    %cst_22 = arith.constant 0.000000e+00 : f32
    %23 = vector.broadcast %cst_22 : f32 to vector<1x128xf32>
    %24 = vector.extract_strided_slice %16 {offsets = [1, 0], sizes = [15, 128], strides = [1, 1]} : vector<16x128xf32> to vector<15x128xf32>
    %25 = tpu.concatenate %24, %23 in 0 : vector<15x128xf32>, vector<1x128xf32> -> vector<16x128xf32>
    %cst_23 = arith.constant 0.000000e+00 : f32
    %26 = vector.broadcast %cst_23 : f32 to vector<16x128xf32>
    %27 = vector.broadcast %18 : vector<1x128xf32> to vector<16x128xf32>
    %28 = arith.addf %26, %27 : vector<16x128xf32>
    %c8_i32 = arith.constant 8 : i32
    %29 = tpu.dynamic_rotate %22 by %c8_i32 dim 1 : vector<16x128xf32>, i32 -> vector<16x128xf32>
    %c8_i32_24 = arith.constant 8 : i32
    %30 = vector.broadcast %c8_i32_24 : i32 to vector<16x128xi32>
    %31 = arith.cmpi sge, %19, %30 : vector<16x128xi32>
    %cst_25 = arith.constant 0.000000e+00 : f32
    %32 = vector.broadcast %cst_25 : f32 to vector<16x128xf32>
    %33 = arith.select %31, %29, %32 : vector<16x128xi1>, vector<16x128xf32>
    %34 = vector.extract_strided_slice %17 {offsets = [0, 0], sizes = [1, 128], strides = [1, 1]} : vector<9x128xf32> to vector<1x128xf32>
    %35 = vector.broadcast %34 : vector<1x128xf32> to vector<16x128xf32>
    %36 = arith.mulf %33, %35 : vector<16x128xf32>
    %37 = arith.addf %28, %36 : vector<16x128xf32>
    %38 = vector.extract_strided_slice %17 {offsets = [1, 0], sizes = [1, 128], strides = [1, 1]} : vector<9x128xf32> to vector<1x128xf32>
    %39 = vector.broadcast %38 : vector<1x128xf32> to vector<16x128xf32>
    %40 = arith.mulf %22, %39 : vector<16x128xf32>
    %41 = arith.addf %37, %40 : vector<16x128xf32>
    %c120_i32 = arith.constant 120 : i32
    %42 = tpu.dynamic_rotate %22 by %c120_i32 dim 1 : vector<16x128xf32>, i32 -> vector<16x128xf32>
    %c120_i32_26 = arith.constant 120 : i32
    %43 = vector.broadcast %c120_i32_26 : i32 to vector<16x128xi32>
    %44 = arith.cmpi slt, %19, %43 : vector<16x128xi32>
    %cst_27 = arith.constant 0.000000e+00 : f32
    %45 = vector.broadcast %cst_27 : f32 to vector<16x128xf32>
    %46 = arith.select %44, %42, %45 : vector<16x128xi1>, vector<16x128xf32>
    %47 = vector.extract_strided_slice %17 {offsets = [2, 0], sizes = [1, 128], strides = [1, 1]} : vector<9x128xf32> to vector<1x128xf32>
    %48 = vector.broadcast %47 : vector<1x128xf32> to vector<16x128xf32>
    %49 = arith.mulf %46, %48 : vector<16x128xf32>
    %50 = arith.addf %41, %49 : vector<16x128xf32>
    %c8_i32_28 = arith.constant 8 : i32
    %51 = tpu.dynamic_rotate %16 by %c8_i32_28 dim 1 : vector<16x128xf32>, i32 -> vector<16x128xf32>
    %c8_i32_29 = arith.constant 8 : i32
    %52 = vector.broadcast %c8_i32_29 : i32 to vector<16x128xi32>
    %53 = arith.cmpi sge, %19, %52 : vector<16x128xi32>
    %cst_30 = arith.constant 0.000000e+00 : f32
    %54 = vector.broadcast %cst_30 : f32 to vector<16x128xf32>
    %55 = arith.select %53, %51, %54 : vector<16x128xi1>, vector<16x128xf32>
    %56 = vector.extract_strided_slice %17 {offsets = [3, 0], sizes = [1, 128], strides = [1, 1]} : vector<9x128xf32> to vector<1x128xf32>
    %57 = vector.broadcast %56 : vector<1x128xf32> to vector<16x128xf32>
    %58 = arith.mulf %55, %57 : vector<16x128xf32>
    %59 = arith.addf %50, %58 : vector<16x128xf32>
    %60 = vector.extract_strided_slice %17 {offsets = [4, 0], sizes = [1, 128], strides = [1, 1]} : vector<9x128xf32> to vector<1x128xf32>
    %61 = vector.broadcast %60 : vector<1x128xf32> to vector<16x128xf32>
    %62 = arith.mulf %16, %61 : vector<16x128xf32>
    %63 = arith.addf %59, %62 : vector<16x128xf32>
    %c120_i32_31 = arith.constant 120 : i32
    %64 = tpu.dynamic_rotate %16 by %c120_i32_31 dim 1 : vector<16x128xf32>, i32 -> vector<16x128xf32>
    %c120_i32_32 = arith.constant 120 : i32
    %65 = vector.broadcast %c120_i32_32 : i32 to vector<16x128xi32>
    %66 = arith.cmpi slt, %19, %65 : vector<16x128xi32>
    %cst_33 = arith.constant 0.000000e+00 : f32
    %67 = vector.broadcast %cst_33 : f32 to vector<16x128xf32>
    %68 = arith.select %66, %64, %67 : vector<16x128xi1>, vector<16x128xf32>
    %69 = vector.extract_strided_slice %17 {offsets = [5, 0], sizes = [1, 128], strides = [1, 1]} : vector<9x128xf32> to vector<1x128xf32>
    %70 = vector.broadcast %69 : vector<1x128xf32> to vector<16x128xf32>
    %71 = arith.mulf %68, %70 : vector<16x128xf32>
    %72 = arith.addf %63, %71 : vector<16x128xf32>
    %c8_i32_34 = arith.constant 8 : i32
    %73 = tpu.dynamic_rotate %25 by %c8_i32_34 dim 1 : vector<16x128xf32>, i32 -> vector<16x128xf32>
    %c8_i32_35 = arith.constant 8 : i32
    %74 = vector.broadcast %c8_i32_35 : i32 to vector<16x128xi32>
    %75 = arith.cmpi sge, %19, %74 : vector<16x128xi32>
    %cst_36 = arith.constant 0.000000e+00 : f32
    %76 = vector.broadcast %cst_36 : f32 to vector<16x128xf32>
    %77 = arith.select %75, %73, %76 : vector<16x128xi1>, vector<16x128xf32>
    %78 = vector.extract_strided_slice %17 {offsets = [6, 0], sizes = [1, 128], strides = [1, 1]} : vector<9x128xf32> to vector<1x128xf32>
    %79 = vector.broadcast %78 : vector<1x128xf32> to vector<16x128xf32>
    %80 = arith.mulf %77, %79 : vector<16x128xf32>
    %81 = arith.addf %72, %80 : vector<16x128xf32>
    %82 = vector.extract_strided_slice %17 {offsets = [7, 0], sizes = [1, 128], strides = [1, 1]} : vector<9x128xf32> to vector<1x128xf32>
    %83 = vector.broadcast %82 : vector<1x128xf32> to vector<16x128xf32>
    %84 = arith.mulf %25, %83 : vector<16x128xf32>
    %85 = arith.addf %81, %84 : vector<16x128xf32>
    %c120_i32_37 = arith.constant 120 : i32
    %86 = tpu.dynamic_rotate %25 by %c120_i32_37 dim 1 : vector<16x128xf32>, i32 -> vector<16x128xf32>
    %c120_i32_38 = arith.constant 120 : i32
    %87 = vector.broadcast %c120_i32_38 : i32 to vector<16x128xi32>
    %88 = arith.cmpi slt, %19, %87 : vector<16x128xi32>
    %cst_39 = arith.constant 0.000000e+00 : f32
    %89 = vector.broadcast %cst_39 : f32 to vector<16x128xf32>
    %90 = arith.select %88, %86, %89 : vector<16x128xi1>, vector<16x128xf32>
    %91 = vector.extract_strided_slice %17 {offsets = [8, 0], sizes = [1, 128], strides = [1, 1]} : vector<9x128xf32> to vector<1x128xf32>
    %92 = vector.broadcast %91 : vector<1x128xf32> to vector<16x128xf32>
    %93 = arith.mulf %90, %92 : vector<16x128xf32>
    %94 = arith.addf %85, %93 : vector<16x128xf32>
    %cst_40 = arith.constant 0.000000e+00 : f32
    %95 = vector.broadcast %cst_40 : f32 to vector<16x128xf32>
    %96 = arith.cmpf oge, %94, %95 : vector<16x128xf32>
    %cst_41 = arith.constant 2.500000e-01 : f32
    %97 = vector.broadcast %cst_41 : f32 to vector<16x128xf32>
    %98 = arith.mulf %97, %94 : vector<16x128xf32>
    %99 = arith.select %96, %94, %98 : vector<16x128xi1>, vector<16x128xf32>
    %100 = arith.truncf %99 : vector<16x128xf32> to vector<16x128xbf16>
    %c0_42 = arith.constant 0 : index
    %c0_43 = arith.constant 0 : index
    %c0_44 = arith.constant 0 : index
    %101 = vector.load %arg9[%c0_42, %c0_43, %c0_44] : memref<1x16x128xbf16, #tpu.memory_space<vmem>>, vector<1x16x128xbf16>
    %102 = vector.shape_cast %101 : vector<1x16x128xbf16> to vector<16x128xbf16>
    %103 = vector.shape_cast %100 : vector<16x128xbf16> to vector<1x16x128xbf16>
    tpu.vector_store %arg9[%c0_42, %c0_43, %c0_44], %103 {strides = array<i32>} : memref<1x16x128xbf16, #tpu.memory_space<vmem>>, vector<1x16x128xbf16>,
    %cst_45 = arith.constant dense<0.000000e+00> : vector<128xf32>
    %104 = vector.multi_reduction <add>, %99, %cst_45 [0] : vector<16x128xf32> to vector<128xf32>
    %105 = vector.shape_cast %104 : vector<128xf32> to vector<1x128xf32>
    %106 = arith.mulf %99, %99 : vector<16x128xf32>
    %cst_46 = arith.constant dense<0.000000e+00> : vector<128xf32>
    %107 = vector.multi_reduction <add>, %106, %cst_46 [0] : vector<16x128xf32> to vector<128xf32>
    %108 = vector.shape_cast %107 : vector<128xf32> to vector<1x128xf32>
    %109 = tpu.concatenate %105, %108 in 0 : vector<1x128xf32>, vector<1x128xf32> -> vector<2x128xf32>
    %c0_47 = arith.constant 0 : index
    %c0_48 = arith.constant 0 : index
    %c0_49 = arith.constant 0 : index
    %110 = vector.load %arg11[%c0_47, %c0_48, %c0_49] : memref<1x2x128xf32, #tpu.memory_space<vmem>>, vector<1x2x128xf32>
    %111 = vector.shape_cast %110 : vector<1x2x128xf32> to vector<2x128xf32>
    %112 = vector.shape_cast %109 : vector<2x128xf32> to vector<1x2x128xf32>
    tpu.vector_store %arg11[%c0_47, %c0_48, %c0_49], %112 {strides = array<i32>} : memref<1x2x128xf32, #tpu.memory_space<vmem>>, vector<1x2x128xf32>,
    return
  }
  func.func @transform_0(%arg0: i32) -> (i32, i32, i32) {
    %c0_i32 = arith.constant 0 : i32
    %c0_i32_0 = arith.constant 0 : i32
    %c0_i32_1 = arith.constant 0 : i32
    return %arg0, %c0_i32, %c0_i32_0 : i32, i32, i32
  }
  func.func @transform_1(%arg0: i32) -> (i32, i32) {
    %c0_i32 = arith.constant 0 : i32
    %c0_i32_0 = arith.constant 0 : i32
    %c0_i32_1 = arith.constant 0 : i32
    return %c0_i32, %c0_i32_0 : i32, i32
  }
  func.func @transform_2(%arg0: i32) -> (i32, i32) {
    %c0_i32 = arith.constant 0 : i32
    %c0_i32_0 = arith.constant 0 : i32
    %c0_i32_1 = arith.constant 0 : i32
    return %c0_i32, %c0_i32_0 : i32, i32
  }
  func.func @transform_3(%arg0: i32) -> (i32, i32) {
    %c0_i32 = arith.constant 0 : i32
    %c0_i32_0 = arith.constant 0 : i32
    %c0_i32_1 = arith.constant 0 : i32
    return %c0_i32, %c0_i32_0 : i32, i32
  }
  func.func @transform_4(%arg0: i32) -> (i32, i32) {
    %c0_i32 = arith.constant 0 : i32
    %c0_i32_0 = arith.constant 0 : i32
    %c0_i32_1 = arith.constant 0 : i32
    return %c0_i32, %c0_i32_0 : i32, i32
  }
  func.func @transform_5(%arg0: i32) -> (i32, i32) {
    %c0_i32 = arith.constant 0 : i32
    %c0_i32_0 = arith.constant 0 : i32
    %c0_i32_1 = arith.constant 0 : i32
    return %c0_i32, %c0_i32_0 : i32, i32
  }
  func.func @transform_6(%arg0: i32) -> (i32, i32) {
    %c0_i32 = arith.constant 0 : i32
    %c0_i32_0 = arith.constant 0 : i32
    %c0_i32_1 = arith.constant 0 : i32
    return %c0_i32, %c0_i32_0 : i32, i32
  }
  func.func @transform_7(%arg0: i32) -> (i32, i32) {
    %c0_i32 = arith.constant 0 : i32
    %c0_i32_0 = arith.constant 0 : i32
    %c0_i32_1 = arith.constant 0 : i32
    return %c0_i32, %c0_i32_0 : i32, i32
  }
  func.func @transform_8(%arg0: i32) -> (i32, i32, i32) {
    %c0_i32 = arith.constant 0 : i32
    %c0_i32_0 = arith.constant 0 : i32
    %c0_i32_1 = arith.constant 0 : i32
    return %arg0, %c0_i32, %c0_i32_0 : i32, i32, i32
  }
  func.func @transform_9(%arg0: i32) -> (i32, i32, i32) {
    %c0_i32 = arith.constant 0 : i32
    %c0_i32_0 = arith.constant 0 : i32
    %c0_i32_1 = arith.constant 0 : i32
    return %arg0, %c0_i32, %c0_i32_0 : i32, i32, i32
  }
  func.func @transform_10(%arg0: i32) -> (i32, i32, i32) {
    %c0_i32 = arith.constant 0 : i32
    %c0_i32_0 = arith.constant 0 : i32
    %c0_i32_1 = arith.constant 0 : i32
    return %arg0, %c0_i32, %c0_i32_0 : i32, i32, i32
  }
}

</mosaic_0001>

<bundles_post_ra>
// kernel: tpu_custom_call.1
= control target key start
LH: loop header
LB: loop body
LE: loop exit
PB: predicated region body
PF: predicated region fallthrough
CT: control target
= control target key end

     0   :  { %s1744_s0 = inlined_call_operand.hbm [shape: f32[2,16,64], index: 0, kind: input, shape index: {}]   ;;  %s1745_s1 = inlined_call_operand.hbm [shape: f32[8,16], index: 1, kind: input, shape index: {}]   ;;  %s1746_s2 = inlined_call_operand.hbm [shape: f32[64,64], index: 2, kind: input, shape index: {}]   ;;  %s1747_s3 = inlined_call_operand.vmem [shape: f32[1,64], index: 3, kind: input, shape index: {}]   ;;  %s1748_s4 = inlined_call_operand.hbm [shape: f32[64,128], index: 4, kind: input, shape index: {}]   ;;  %s1749_s5 = inlined_call_operand.vmem [shape: f32[1,128], index: 5, kind: input, shape index: {}]   ;;  %s1750_s6 = inlined_call_operand.hbm [shape: f32[9,128], index: 6, kind: input, shape index: {}]   ;;  %s1751_s7 = inlined_call_operand.vmem [shape: f32[1,128], index: 7, kind: input, shape index: {}]   ;;  %s1752_s8 = inlined_call_operand.hbm [shape: bf16[2,16,128], index: 8, kind: output, shape index: {0}]   ;;  %s1753_s9 = inlined_call_operand.hbm [shape: f32[2,8,64], index: 9, kind: output, shape index: {1}]   ;;  %s1754_s10 = inlined_call_operand.hbm [shape: f32[2,2,128], index: 10, kind: output, shape index: {2}]  }
   0x1   :  { %1758 = sst [smem:[#allocation20_spill]] %s1745_s1 }
   0x2   :  { %1759 = sst [smem:[#allocation21_spill]] %s1746_s2 }
   0x3   :  { %1760 = sst [smem:[#allocation22_spill]] %s1748_s4 }
   0x4   :  { %1761 = sst [smem:[#allocation23_spill]] %s1750_s6 }
   0x5   :  { %16 = vsyncpa [#allocation3], 0 }
   0x6   :  { %18 = vsyncpa [#allocation3 + $0x1], 0 }
   0x7   :  { %19 = vsyncpa [#allocation6], 0 }
   0x8   :  { %20 = vsyncpa [#allocation9], 0 }
   0x9   :  { %21 = vsyncpa [#allocation4], 0 }
   0xa   :  { %23 = vsyncpa [#allocation4 + $0x1], 0 }
   0xb   :  { %24 = vsyncpa [#allocation13], 0 }
   0xc   :  { %26 = vsyncpa [#allocation13 + $0x1], 0  ;;  %s1436_s13 = smov 0   ;;  %s1438_s14 = smov 0  }
   0xd   :  { %s1440_s15 = smov 0   ;;  %s1442_s16 = smov 0  }
   0xe LB: > { %s1457_s17 = sadd.s32 4294967295, %s1369_s16   ;;  %s1755_s18 = sadd.s32 4294967294, %s1369_s16   ;;  %s1369_s16 = sphi %s1442_s16, %s1779_s16   ;;  %s1365_s15 = sphi %s1440_s15, %s1778_s15   ;;  %s1361_s14 = sphi %s1438_s14, %s1777_s14   ;;  %s1357_s13 = sphi %s1436_s13, %s1776_s13  }
   0xf   : > { %p52_p0 = scmp.ne.s32.totalorder %s1361_s14, %s1357_s13  ;;  %p53_p1 = scmp.eq.s32.totalorder %s1457_s17, 0 }
  0x10   : > { %p223_p2 = scmp.eq.s32.totalorder %s1457_s17, 1  ;;  %p229_p3 = scmp.eq.s32.totalorder %s1755_s18, 1 }
  0x11   : > { %p1468_p4 = por %p53_p1, %p52_p0  ;;  %p932_p5 = scmp.ge.s32.totalorder %s1369_s16, 1 }
  0x12   : > { %p1473_p6 = por %p229_p3, %p52_p0  ;;  %p288_p7 = scmp.lt.s32.totalorder %s1369_s16, 3 }
  0x13   : > { %s1764_s1 = sld [smem:[#allocation20_spill]]  ;;  %s1371_s25 = smov [#allocation5]  }
  0x14   : > { %p1481_p8 = pnand %p932_p5, %p288_p7  ;;  %s302_s26 = sshll.u32 %s1371_s25, 4  ;;  %s303_s26 = int_to_ptr.vmem [resolvable:$true] %s302_s26 }
  0x15   : > { %s1767_s4 = sld [smem:[#allocation22_spill]]  ;;  %s1372_s11 = smov [#allocation8]  }
  0x16   : > { %p1002_p10 = pneg %p1481_p8  ;;  %s330_s12 = sshll.u32 %s1372_s11, 4  ;;  %s331_s12 = int_to_ptr.vmem [resolvable:$true] %s330_s12 }
  0x17   : > { %s1768_s2 = sld [smem:[#allocation21_spill]]  ;;  %s1756_s28 = smov 128  }
  0x18   : > { %p1490_p11 = pnand %p1002_p10, %p53_p1  ;;  %s1757_s29 = smov 8  }
  0x19   : > { %s300_s23 = sshll.u32 %s1764_s1, 4  ;;  %s1769_s6 = sld [smem:[#allocation23_spill]]  ;;  %s301_s23 = int_to_ptr.hbm [resolvable:$true] %s300_s23 }
  0x1a   : > { %1005 = dma.hbm_to_vmem [thread:$0]  (!%p1490_p11), %s301_s23, 128, %s303_s26, [#allocation6]  }
  0x1b   : > { %s328_s30 = sshll.u32 %s1767_s4, 4  ;;  %s1375_s21 = smov [#allocation7]   ;;  %s329_s30 = int_to_ptr.hbm [resolvable:$true] %s328_s30 }
  0x1c   : > { %1011 = dma.hbm_to_vmem [thread:$0]  (!%p1490_p11), %s329_s30, 1024, %s331_s12, [#allocation9], %s1756_s28, %s1756_s28, %s1757_s29  }
  0x1d   : > { %s311_s25 = sshll.u32 %s1768_s2, 4  ;;  %s313_s22 = sshll.u32 %s1375_s21, 4  ;;  %s312_s25 = int_to_ptr.hbm [resolvable:$true] %s311_s25  ;;  %s314_s22 = int_to_ptr.vmem [resolvable:$true] %s313_s22 }
  0x1e   : > { %1008 = dma.hbm_to_vmem [thread:$0]  (!%p1490_p11), %s312_s25, 1024, %s314_s22, [#allocation6], %s1756_s28, %s1756_s28, %s1757_s29  }
  0x1f   : > { %s345_s11 = sshll.u32 %s1769_s6, 4  ;;  %s1376_s18 = smov [#allocation10]   ;;  %s346_s11 = int_to_ptr.hbm [resolvable:$true] %s345_s11 }
  0x20   : > { %s347_s30 = sshll.u32 %s1376_s18, 4  ;;  %s1521_s12 = sadd.s32 1, %s1369_s16   ;;  %s348_s30 = int_to_ptr.vmem [resolvable:$true] %s347_s30 }
  0x21   : > { %1014 = dma.hbm_to_vmem [thread:$0]  (!%p1490_p11), %s346_s11, 256, %s348_s30, [#allocation9], %s1756_s28, %s1756_s28, %s1757_s29  }
  0x22   : > { %s39_s23 = sadd.s32 1, %s1365_s15  ;;  %s36_s26 = ssub.s32 %s1369_s16, %s1521_s12 }
  0x23   : > { %p46_p12 = scmp.ne.s32.totalorder %s1365_s15, %s1361_s14  ;;  %p37_p13 = scmp.eq.s32.totalorder %s36_s26, 0 }
  0x24   : > { %p47_p0 = scmp.eq.s32.totalorder %s1369_s16, 0  ;;  %p1033_p5 = scmp.lt.s32.totalorder %s1369_s16, 2 }
  0x25   : > { %p1531_p3 = por %p223_p2, %p46_p12  ;;  %s364_s27 = sand.u32 1, %s1365_s15  }
  0x26   : > { %s1537_s18 = scalar_select %p37_p13, %s1365_s15, %s39_s23  }
  0x27   : > { %p48_p7 = por %p47_p0, %p46_p12  ;;  %s938_s21 = sshll.u32 %s364_s27, 4 }
  0x28   : > { %s963_s11 = sshll.u32 %s1369_s16, 4  ;;  %s368_s29 = scalar_lea.vmem [#allocation2], %s938_s21 }
  0x29   : > { %s373_s28 = scalar_lea.hbm %s1744_s0, %s963_s11  ;;  %s376_s1 = sshll.u32 %s368_s29, 4  ;;  %s377_s1 = int_to_ptr.vmem [resolvable:$true] %s376_s1 }
  0x2a   : > { %s374_s26 = sshll.u32 %s373_s28, 4  ;;  %p1544_p2 = pnand %p1033_p5, %p48_p7  ;;  %s375_s26 = int_to_ptr.hbm [resolvable:$true] %s374_s26 }
  0x2b   : > { %s365_s23 = scalar_lea.sflag [#allocation3], %s364_s27  ;;  %s1205_s4 = sshra.s32 %s375_s26, 4  ;;  %s1206_s4 = int_to_ptr.hbm [resolvable:$true] %s1205_s4 }
  0x2c   : > { %s1207_s6 = scalar_lea.hbm %s1206_s4, 16  ;;  %p1209_p11 = pneg %p1544_p2 }
  0x2d   : > { %p1208_p10 = scmp.ne.s32.totalorder %s1206_s4, %s1207_s6  ;;  %s1212_s28 = scalar_lea.hbm %s1744_s0, 32 }
  0x2e   : > { %p1213_p0 = scmp.lt.s32.totalorder %s1206_s4, %s1744_s0  ;;  %p1214_p5 = scmp.lt.s32.totalorder %s1212_s28, %s1207_s6 }
  0x2f   : > { %p1210_p12 = pnand %p1209_p11, %p1208_p10 }
  0x30   : > { %p1215_p7 = por %p1214_p5, %p1213_p0 }
  0x31   : > { %p1211_p13 = pneg %p1210_p12 }
  0x33   : > { %p1216_p9 = pnand %p1215_p7, %p1211_p13 }
  0x35   : > { %1219 = shalt.err (!%p1216_p9)
}
  0x36   : > { %s1772_s27 = smov 8   ;;  %s1773_s30 = smov 128  }
  0x37   : > { %1018 = dma.hbm_to_vmem [thread:$0]  (!%p1544_p2), %s375_s26, 256, %s377_s1, %s365_s23, %s1773_s30, %s1773_s30, %s1772_s27  }
  0x38   : > { %388 = sbr.rel (%p1481_p8) target bundleno = 391 (0x187), region = 52  ;;  %s1564_s11 = sand.u32 (!%p1481_p8), 1, %s1361_s14  }
  0x39   : > { %s942_s4 = sshll.u32 (!%p1481_p8), %s1564_s11, 4  ;;  %s391_s6 = scalar_lea.sflag (!%p1481_p8), [#allocation3], %s1564_s11 }
  0x3a   : > { %s394_s21 = scalar_lea.vmem (!%p1481_p8), [#allocation2], %s942_s4 }
  0x3d   : > { %1336 = dma.done.wait (%p1468_p4), %s391_s6, 256  }
  0x3e   : > { %1338 = vsyncadd (%p1468_p4), %s391_s6, 4294967040 }
  0x3f   : > { %1340 = dma.done.wait (%p53_p1), [#allocation6], 1152  }
  0x40   : > { %1342 = vsyncadd (%p53_p1), [#allocation6], 4294966144 }
  0x41   : > { %1344 = dma.done.wait (%p53_p1), [#allocation9], 1280  }
  0x42   : > { %1346 = vsyncadd (%p53_p1), [#allocation9], 4294966016  ;;  %v533_v0 = vld [vmem:[#allocation8 + $0x38] sm:$0xff]  ;;  %v532_v1 = vld [vmem:[#allocation8 + $0x30] sm:$0xff]  ;;  %vm465_vm0 = vcmask 130048   ;;  %vm501_vm1 = vcmask 523264   ;;  %v570_v33 = vlaneseq }
  0x43   : > { %552 = vmatpush.msra.mxu2 %v533_v0  ;;  %970 = vmatpush.msra.mxu3 %v533_v0  ;;  %v531_v2 = vld [vmem:[#allocation8 + $0x28] sm:$0xff]  ;;  %v463_v3 = vld [vmem:[%s394_s21 + $0x8] sm:$0xff]  ;;  %v464_v6 = vld [vmem:[#allocation5] sm:$0xff]  ;;  %vm574_vm2 = vcmask 1040384   ;;  %s1377_s19 = smov 8   ;;  %s1378_s24 = smov 120  }
  0x44   : > { %v530_v4 = vld [vmem:[#allocation8 + $0x20] sm:$0xff]  ;;  %483 = vmatpush.msra.mxu0 %v463_v3  ;;  %v462_v5 = vld [vmem:[%s394_s21] sm:$0xff]  ;;  %v528_v8 = vld [vmem:[#allocation8 + $0x10] sm:$0xff]  ;;  %vm581_vm3 = vcmask 1046528   ;;  %v1614_v35 = vand.u32 127, %v570_v33  ;;  %s964_s28 = sshll.u32 %s1457_s17, 3 }
  0x45   : > { %553 = vmatpush.msra.mxu2 %v532_v1  ;;  %971 = vmatpush.msra.mxu3 %v532_v1  ;;  %v529_v7 = vld [vmem:[#allocation8 + $0x18] sm:$0xff]  ;;  %v527_v9 = vld [vmem:[#allocation8 + $0x8] sm:$0xff]  ;;  %v526_v10 = vld [vmem:[#allocation8] sm:$0xff]  ;;  %s947_s29 = sshll.u32 %s1564_s11, 3  ;;  %s741_s30 = scalar_lea.hbm %s1753_s9, %s964_s28 }
  0x46   : > { %484 = vmatpush.msra.mxu0 %v462_v5  ;;  %v496_v11 = vld [vmem:[#allocation7 + $0x38] sm:$0xff]  ;;  %v495_v13 = vld [vmem:[#allocation7 + $0x30] sm:$0xff]  ;;  %v494_v14 = vld [vmem:[#allocation7 + $0x28] sm:$0xff]  ;;  %vm596_vm4 = vcmp.ge.s32.totalorder %v1614_v35, 8  ;;  %vm613_vm5 = vcmp.lt.s32.totalorder %v1614_v35, 120  ;;  %s708_s21 = sand.u32 1, %s1457_s17  }
  0x47   : > { %554 = vmatpush.msra.mxu2 %v531_v2  ;;  %972 = vmatpush.msra.mxu3 %v531_v2  ;;  %v1081_v12 = vld [vmem:[%s1749_s5] ss:$0 sm:$0xff]  ;;  %v493_v16 = vld [vmem:[#allocation7 + $0x20] sm:$0xff]  ;;  %v491_v21 = vld [vmem:[#allocation7 + $0x10] sm:$0xff]  ;;  %s454_s1 = scalar_lea.vmem [#allocation12], %s947_s29 }
  0x48   : > { %950 = vmatmul.msk.f32.vlgmr.msra.gmra.mxu0 %vm465_vm0, %v464_v6  ;;  %513 = vmatpush.msra.mxu1 %v496_v11  ;;  %v492_v19 = vld [vmem:[#allocation7 + $0x18] sm:$0xff]  ;;  %v490_v24 = vld [vmem:[#allocation7 + $0x8] sm:$0xff]  ;;  %v489_v25 = vld [vmem:[#allocation7] sm:$0xff]  ;;  %s743_s2 = sshll.u32 %s454_s1, 4  ;;  %s744_s2 = int_to_ptr.vmem [resolvable:$true] %s743_s2 }
  0x49   : > { %555 = vmatpush.msra.mxu2 %v530_v4  ;;  %973 = vmatpush.msra.mxu3 %v530_v4  ;;  %v1616_v36 = vld [vmem:[#allocation10] sm:$0xff]  ;;  %v1083_v40 = vld [vmem:[%s1751_s7] ss:$0 sm:$0xff] }
  0x4a   : > { %514 = vmatpush.msra.mxu1 %v495_v13  ;;  %v599_v37 = vperm.slane %v1616_v36, 0  ;;  %v604_v38 = vperm.slane %v1616_v36, 1  ;;  %v616_v43 = vperm.slane %v1616_v36, 2  ;;  %v627_v48 = vperm.slane %v1616_v36, 3 }
  0x4b   : > { %556 = vmatpush.msra.mxu2 %v529_v7  ;;  %974 = vmatpush.msra.mxu3 %v529_v7  ;;  %v632_v53 = vperm.slane %v1616_v36, 4  ;;  %v643_v6 = vperm.slane %v1616_v36, 5  ;;  %v1084_v7 = vld [vmem:[%s1747_s3] ss:$0 sm:$0xff]  ;;  %v659_v13 = vperm.slane %v1616_v36, 7 }
  0x4c   : > { %515 = vmatpush.msra.mxu1 %v494_v14 }
  0x4d   : > { %557 = vmatpush.msra.mxu2 %v528_v8  ;;  %975 = vmatpush.msra.mxu3 %v528_v8 }
  0x4e   : > { %516 = vmatpush.msra.mxu1 %v493_v16 }
  0x4f   : > { %558 = vmatpush.msra.mxu2 %v527_v9  ;;  %976 = vmatpush.msra.mxu3 %v527_v9  ;;  %v654_v9 = vperm.slane %v1616_v36, 6 }
  0x50   : > { %517 = vmatpush.msra.mxu1 %v492_v19 }
  0x51   : > { %559 = vmatpush.msra.mxu2 %v526_v10  ;;  %977 = vmatpush.msra.mxu3 %v526_v10 }
  0x52   : > { %952 = vmatmul.msk.f32.vlgmr.msra.gmra.mxu2 %vm501_vm1, %v462_v5  ;;  %953 = vmatmul.msk.f32.vlgmr.msra.gmra.mxu3 %vm501_vm1, %v463_v3 }
  0x53   : > { %518 = vmatpush.msra.mxu1 %v491_v21 }
  0x55   : > { %519 = vmatpush.msra.mxu1 %v490_v24 }
  0x57   : > { %520 = vmatpush.msra.mxu1 %v489_v25 }
  0xc5   : > { %v486_v27 = vpop.f32.mrf.mxu0 }
  0xc6   : > { %951 = vmatmul.msk.f32.vlgmr.msra.gmra.mxu1 %vm501_vm1, %v486_v27 }
  0xd5   : > { %v561_v15 = vpop.f32.mrf.mxu2  ;;  %v564_v18 = vpop.f32.mrf.mxu3 }
  0xd6   : > { %v1585_v17 = vadd.f32 %v1081_v12, %v561_v15  ;;  %v1590_v22 = vadd.f32 %v1081_v12, %v564_v18 }
  0xd8   : > { %621 = vrot.lane.b32.xlu2 %v1585_v17, %s1377_s19  ;;  %v575_v20 = vrot.slane %v1585_v17, 7  ;;  %v576_v26 = vrot.slane %v1590_v22, 7  ;;  %v582_v29 = vrot.slane %v1585_v17, 1  ;;  %v583_v30 = vrot.slane %v1590_v22, 1 }
  0xd9   : > { %v633_v61 = vmul.f32 %v632_v53, %v1585_v17 }
  0xda   : > { %v580_v23 = vsel %vm574_vm2, 0.0, %v575_v20  ;;  %v577_v28 = vsel %vm574_vm2, %v575_v20, %v576_v26  ;;  %v1602_v31 = vsel %vm581_vm3, %v582_v29, %v583_v30  ;;  %v1608_v32 = vsel %vm581_vm3, %v583_v30, 0.0 }
  0xdb   : > { %609 = vrot.lane.b32.xlu1 %v580_v23, %s1378_s24  ;;  %592 = vrot.lane.b32.xlu0 %v580_v23, %s1377_s19  ;;  %v605_v47 = vmul.f32 %v604_v38, %v580_v23  ;;  %v606_v63 = vmul.f32 %v604_v38, %v577_v28 }
  0xe0   : > { %623 = vrot.lane.b32.xlu2 %v1590_v22, %s1377_s19 }
  0xe3   : > { %611 = vrot.lane.b32.xlu1 %v577_v28, %s1378_s24  ;;  %594 = vrot.lane.b32.xlu0 %v577_v28, %s1377_s19 }
  0xe8   : > { %648 = vrot.lane.b32.xlu2 %v1602_v31, %s1377_s19 }
  0xeb   : > { %639 = vrot.lane.b32.xlu1 %v1590_v22, %s1378_s24  ;;  %637 = vrot.lane.b32.xlu0 %v1585_v17, %s1378_s24  ;;  %v634_v17 = vmul.f32 %v632_v53, %v1590_v22 }
  0xf0   : > { %666 = vrot.lane.b32.xlu2 %v1608_v32, %s1378_s24 }
  0xf3   : > { %664 = vrot.lane.b32.xlu1 %v1602_v31, %s1378_s24  ;;  %650 = vrot.lane.b32.xlu0 %v1608_v32, %s1377_s19  ;;  %s745_s19 = sshll.u32 %s741_s30, 4  ;;  %s1665_s24 = scalar_lea.sflag [#allocation13], %s708_s21  ;;  %s746_s19 = int_to_ptr.hbm [resolvable:$true] %s745_s19 }
  0xf4   : > { %s1249_s26 = sshra.s32 %s746_s19, 4  ;;  %s1255_s30 = scalar_lea.hbm %s1753_s9, 16  ;;  %s1250_s26 = int_to_ptr.hbm [resolvable:$true] %s1249_s26 }
  0xf5   : > { %s1251_s23 = scalar_lea.hbm %s1250_s26, 8  ;;  %p1256_p9 = scmp.lt.s32.totalorder %s1250_s26, %s1753_s9 }
  0xf6   : > { %p1252_p1 = scmp.ne.s32.totalorder %s1250_s26, %s1251_s23  ;;  %p1257_p2 = scmp.lt.s32.totalorder %s1255_s30, %s1251_s23 }
  0xf8   : > { %p1253_p4 = pnand %p1252_p1, %p1531_p3  ;;  %p1258_p10 = por %p1257_p2, %p1256_p9 }
  0xfa   : > { %p1254_p8 = pneg %p1253_p4 }
  0xfc   : > { %p1259_p11 = pnand %p1258_p10, %p1254_p8 }
 0x132   : > { %v622_v34 = vpop.permute.xlu2 %621 }
 0x133   : > { %v625_v50 = vsel %vm596_vm4, %v622_v34, 0.0 }
 0x134   : > { %v628_v54 = vmul.f32 %v627_v48, %v625_v50 }
 0x13a   : > { %v624_v45 = vpop.permute.xlu2 %623 }
 0x13b   : > { %v626_v2 = vsel %vm596_vm4, %v624_v45, 0.0 }
 0x13c   : > { %v629_v8 = vmul.f32 %v627_v48, %v626_v2 }
 0x142   : > { %v649_v3 = vpop.permute.xlu2 %648 }
 0x143   : > { %v652_v14 = vsel %vm596_vm4, %v649_v3, 0.0  ;;  %v522_v16 = vpop.f32.mrf.mxu1 }
 0x144   : > { %v523_v20 = vadd.f32 %v1084_v7, %v522_v16  ;;  %v655_v21 = vmul.f32 %v654_v9, %v652_v14 }
 0x146   : > { %525 = vst.msk [vmem:[%s454_s1] sm:$0xff] %vm501_vm1, %v523_v20 }
 0x14d   : > { %v610_v39 = vpop.permute.xlu1 %609  ;;  %v593_v41 = vpop.permute.xlu0 %592 }
 0x14e   : > { %v597_v42 = vsel %vm596_vm4, %v593_v41, 0.0  ;;  %v614_v46 = vsel %vm613_vm5, %v610_v39, 0.0 }
 0x14f   : > { %v600_v44 = vmul.f32 %v599_v37, %v597_v42  ;;  %v617_v51 = vmul.f32 %v616_v43, %v614_v46 }
 0x151   : > { %v602_v49 = vadd.f32 %v1083_v40, %v600_v44 }
 0x153   : > { %v607_v52 = vadd.f32 %v605_v47, %v602_v49 }
 0x155   : > { %v619_v55 = vadd.f32 %v617_v51, %v607_v52  ;;  %v612_v56 = vpop.permute.xlu1 %611  ;;  %v595_v57 = vpop.permute.xlu0 %594 }
 0x156   : > { %v598_v58 = vsel %vm596_vm4, %v595_v57, 0.0  ;;  %v615_v62 = vsel %vm613_vm5, %v612_v56, 0.0 }
 0x157   : > { %v601_v59 = vmul.f32 %v599_v37, %v598_v58  ;;  %v630_v60 = vadd.f32 %v628_v54, %v619_v55  ;;  %v618_v4 = vmul.f32 %v616_v43, %v615_v62 }
 0x159   : > { %v603_v0 = vadd.f32 %v1083_v40, %v601_v59  ;;  %v635_v1 = vadd.f32 %v633_v61, %v630_v60 }
 0x15b   : > { %v608_v5 = vadd.f32 %v606_v63, %v603_v0 }
 0x15d   : > { %v620_v10 = vadd.f32 %v618_v4, %v608_v5  ;;  %v640_v11 = vpop.permute.xlu1 %639  ;;  %v638_v12 = vpop.permute.xlu0 %637 }
 0x15e   : > { %v641_v15 = vsel %vm613_vm5, %v638_v12, 0.0  ;;  %v642_v25 = vsel %vm613_vm5, %v640_v11, 0.0 }
 0x15f   : > { %v631_v18 = vadd.f32 %v629_v8, %v620_v10  ;;  %v644_v19 = vmul.f32 %v643_v6, %v641_v15 }
 0x161   : > { %v636_v23 = vadd.f32 %v634_v17, %v631_v18  ;;  %v646_v24 = vadd.f32 %v644_v19, %v635_v1 }
 0x162   : > { %1262 = shalt.err (!%p1259_p11)
}
 0x163   : > { %997 = dma.vmem_to_hbm [thread:$0]  (%p1531_p3), %s744_s2, 128, %s746_s19, %s1665_s24   ;;  %v660_v22 = vmul.f32 %v659_v13, %v1602_v31  ;;  %v657_v26 = vadd.f32 %v655_v21, %v646_v24  ;;  %v667_v27 = vpop.permute.xlu2 %666  ;;  %v1082_v28 = vld [vmem:[#allocation10 + $0x8] ss:$0 sm:$0xff]  ;;  %v645_v29 = vmul.f32 %v643_v6, %v642_v25  ;;  %v661_v41 = vmul.f32 %v659_v13, %v1608_v32 }
 0x164   : > { %v669_v31 = vsel %vm613_vm5, %v667_v27, 0.0  ;;  %s725_s2 = scalar_lea.hbm %s1752_s8, %s964_s28  ;;  %s447_s19 = scalar_lea.vmem [#allocation11], %s947_s29 }
 0x165   : > { %v665_v30 = vpop.permute.xlu1 %664  ;;  %v662_v33 = vadd.f32 %v660_v22, %v657_v26  ;;  %v651_v34 = vpop.permute.xlu0 %650  ;;  %v647_v38 = vadd.f32 %v645_v29, %v636_v23  ;;  %v672_v44 = vmul.f32 %v1082_v28, %v669_v31  ;;  %s726_s26 = sshll.u32 %s447_s19, 4  ;;  %s728_s23 = sshll.u32 %s725_s2, 4  ;;  %s1693_s26 = int_to_ptr.vmem [resolvable:$true] %s726_s26  ;;  %s729_s23 = int_to_ptr.hbm [resolvable:$true] %s728_s23 }
 0x166   : > { %v668_v36 = vsel %vm613_vm5, %v665_v30, 0.0  ;;  %v653_v37 = vsel %vm596_vm4, %v651_v34, 0.0  ;;  %s704_s28 = scalar_lea.sflag [#allocation4], %s1564_s11  ;;  %s1277_s29 = sshra.s32 %s729_s23, 4  ;;  %s1278_s29 = int_to_ptr.hbm [resolvable:$true] %s1277_s29 }
 0x167   : > { %v671_v39 = vmul.f32 %v1082_v28, %v668_v36  ;;  %v656_v40 = vmul.f32 %v654_v9, %v653_v37  ;;  %s1279_s22 = scalar_lea.hbm %s1278_s29, 8  ;;  %s1283_s4 = scalar_lea.hbm %s1752_s8, 16 }
 0x168   : > { %p1280_p12 = scmp.ne.s32.totalorder %s1278_s29, %s1279_s22  ;;  %p1284_p5 = scmp.lt.s32.totalorder %s1278_s29, %s1752_s8 }
 0x169   : > { %v673_v42 = vadd.f32 %v671_v39, %v662_v33  ;;  %v658_v43 = vadd.f32 %v656_v40, %v647_v38  ;;  %p1285_p7 = scmp.lt.s32.totalorder %s1283_s4, %s1279_s22 }
 0x16a   : > { %p1281_p13 = pnand %p1280_p12, %p1531_p3 }
 0x16b   : > { %v677_v45 = vmul.f32 0.25, %v673_v42  ;;  %v663_v46 = vadd.f32 %v661_v41, %v658_v43  ;;  %vm675_vm6 = vcmp.ge.f32.partialorder %v673_v42, 0.0  ;;  %p1286_p1 = por %p1285_p7, %p1284_p5 }
 0x16c   : > { %p1282_p0 = pneg %p1281_p13 }
 0x16d   : > { %v674_v47 = vadd.f32 %v672_v44, %v663_v46  ;;  %v679_v35 = vsel %vm675_vm6, %v673_v42, %v677_v45 }
 0x16e   : > { %v692_v49 = vmul.f32 %v679_v35, %v679_v35  ;;  %p1287_p4 = pnand %p1286_p1, %p1282_p0 }
 0x16f   : > { %vm676_vm7 = vcmp.ge.f32.partialorder %v674_v47, 0.0  ;;  %v678_v32 = vmul.f32 0.25, %v674_v47 }
 0x171   : > { %v680_v48 = vsel %vm676_vm7, %v674_v47, %v678_v32 }
 0x172   : > { %v968_v50 = vpack.c.bf16 %v680_v48, %v679_v35  ;;  %v685_v51 = vadd.f32 %v680_v48, %v679_v35  ;;  %v693_v52 = vmul.f32 %v680_v48, %v680_v48 }
 0x174   : > { %v686_v53 = vrot.slane %v685_v51, 4  ;;  %v694_v54 = vadd.f32 %v693_v52, %v692_v49  ;;  %969 = vst [vmem:[%s447_s19] sm:$0xff] %v968_v50  }
 0x175   : > { %1290 = shalt.err (!%p1287_p4)
}
 0x176   : > { %s1379_s1 = smov 64   ;;  %s1380_s2 = smov 4   ;;  %v687_v55 = vadd.f32 %v686_v53, %v685_v51  ;;  %v695_v56 = vrot.slane %v694_v54, 4 }
 0x177   : > { %996 = dma.vmem_to_hbm [thread:$0]  (%p1531_p3), %s1693_s26, 128, %s729_s23, %s704_s28, %s1379_s1, %s1379_s1, %s1380_s2  }
 0x178   : > { %v688_v57 = vrot.slane %v687_v55, 2  ;;  %v696_v58 = vadd.f32 %v695_v56, %v694_v54  ;;  %s949_s19 = sshll.u32 %s1564_s11, 1  ;;  %s960_s27 = sshll.u32 %s1457_s17, 1 }
 0x179   : > { %s755_s30 = scalar_lea.hbm %s1754_s10, %s960_s27  ;;  %s461_s4 = scalar_lea.vmem [#allocation14], %s949_s19 }
 0x17a   : > { %v689_v59 = vadd.f32 %v688_v57, %v687_v55  ;;  %v697_v60 = vrot.slane %v696_v58, 2  ;;  %s757_s6 = sshll.u32 %s461_s4, 4  ;;  %s759_s21 = sshll.u32 %s755_s30, 4  ;;  %s758_s6 = int_to_ptr.vmem [resolvable:$true] %s757_s6  ;;  %s760_s21 = int_to_ptr.hbm [resolvable:$true] %s759_s21 }
 0x17b   : > { %s1305_s17 = sshra.s32 %s760_s21, 4  ;;  %s1311_s28 = scalar_lea.hbm %s1754_s10, 4  ;;  %s1306_s17 = int_to_ptr.hbm [resolvable:$true] %s1305_s17 }
 0x17c   : > { %v690_v61 = vrot.slane %v689_v59, 1  ;;  %v698_v62 = vadd.f32 %v697_v60, %v696_v58  ;;  %s1307_s11 = scalar_lea.hbm %s1306_s17, 2  ;;  %p1312_p10 = scmp.lt.s32.totalorder %s1306_s17, %s1754_s10 }
 0x17d   : > { %p1308_p8 = scmp.ne.s32.totalorder %s1306_s17, %s1307_s11  ;;  %p1313_p11 = scmp.lt.s32.totalorder %s1311_s28, %s1307_s11 }
 0x17e   : > { %v699_v63 = vrot.slane %v698_v62, 1  ;;  %v691_v0 = vadd.f32 %v690_v61, %v689_v59 }
 0x17f   : > { %p1309_p9 = pnand %p1308_p8, %p1531_p3  ;;  %p1314_p12 = por %p1313_p11, %p1312_p10 }
 0x180   : > { %v700_v1 = vadd.f32 %v699_v63, %v698_v62 }
 0x181   : > { %p1310_p2 = pneg %p1309_p9 }
 0x182   : > { %v701_v2 = vsel %vm574_vm2, %v691_v0, %v700_v1 }
 0x183   : > { %702 = vst [vmem:[%s461_s4] sm:$0x3] %v701_v2  ;;  %p1315_p13 = pnand %p1314_p12, %p1310_p2 }
 0x185   : > { %1318 = shalt.err (!%p1315_p13)
}
 0x186   : > { %998 = dma.vmem_to_hbm [thread:$0]  (%p1531_p3), %s758_s6, 32, %s760_s21, %s1665_s24  }
 0x187 PF: > { %s771_s19 = sand.u32 1, %s1357_s13   ;;  %p1774_p0 = scmp.ge.s32.totalorder %s1369_s16, 2 }
 0x188   : > { %s772_s27 = scalar_lea.sflag [#allocation4], %s771_s19 }
 0x189   : > { %p1020_p5 = pnand %p1774_p0, %p1473_p6 }
 0x18b   : > { %p1021_p7 = pneg %p1020_p5 }
 0x18d   : > { %1348 = dma.done.wait (%p1021_p7), %s772_s27, 128  }
 0x18e   : > { %1350 = vsyncadd (%p1021_p7), %s772_s27, 4294967168  ;;  %s1775_s29 = sadd.s32 4294967294, %s1369_s16  }
 0x18f   : > { %s781_s22 = sand.u32 1, %s1775_s29  }
 0x190   : > { %s782_s30 = scalar_lea.sflag [#allocation13], %s781_s22 }
 0x191   : > { %1352 = dma.done.wait (%p1021_p7), %s782_s30, 160  }
 0x192   : > { %1354 = vsyncadd (%p1021_p7), %s782_s30, 4294967136  ;;  %p29_p3 = scmp.ge.s32.totalorder %s1521_s12, 4   ;;  %s1776_s13 = smov %s1361_s14 }
 0x193   : > { %s1777_s14 = smov %s1365_s15  ;;  %s1778_s15 = smov %s1537_s18 }
 0x194   : > { %s1779_s16 = smov %s1521_s12  ;;  %31 = sbr.rel (!%p29_p3) target bundleno = 14 (0xe), region = 145 }
 0x199   :  { %798 = vsyncpa [#allocation3], 1 }
 0x19a   :  { %800 = vsyncpa [#allocation3 + $0x1], 1 }
 0x19b   :  { %801 = vsyncpa [#allocation6], 1 }
 0x19c   :  { %802 = vsyncpa [#allocation9], 1 }
 0x19d   :  { %803 = vsyncpa [#allocation4], 1 }
 0x19e   :  { %805 = vsyncpa [#allocation4 + $0x1], 1 }
 0x19f   :  { %806 = vsyncpa [#allocation13], 1 }
 0x1a0   :  { %808 = vsyncpa [#allocation13 + $0x1], 1 }

</bundles_post_ra>
